<compile_context>
chip_gen: v7x
topology: tpu7x:2x2x1
jax: 0.10.0
libtpu: 0.0.40
codegen_flags: <defaults>
</compile_context>

<pallas_src>
import jax
import jax.numpy as jnp
from jax.experimental import pallas as pl
from jax.experimental.pallas import tpu as pltpu


def _concat_kernel(s_ref, d_ref, o_ref):
    # One full-width store of the output tile (lane-dense, unmasked) rather
    # than two partial slab stores at an unaligned column offset.
    o_ref[...] = jnp.concatenate([s_ref[...], d_ref[...]], axis=-1)


def _pick_row_tile(n: int) -> int:
    # Biggest pipelined row tile up to 512; multiple of 16 keeps packed
    # (bf16/int8) sublanes dense. For small batches one full-array block is
    # both legal (block dim == array dim) and optimal.
    if n <= 512:
        return n
    return 512


class StaticDynamicCombiner:
    """JAX/Pallas port of the PyTorch StaticDynamicCombiner module."""

    def __init__(self, mode, static_emb_dim, dynamic_emb_dim):
        self.mode = mode
        self.static_emb_dim = static_emb_dim
        self.dynamic_emb_dim = dynamic_emb_dim
        if mode == "concat":
            self.combined_emb_dim = static_emb_dim + dynamic_emb_dim
            self.use_static_emb = True
            self.use_dynamic_emb = True
        elif mode == "static_only":
            self.combined_emb_dim = static_emb_dim
            self.use_static_emb = True
            self.use_dynamic_emb = False
        elif mode == "dynamic_only":
            self.combined_emb_dim = dynamic_emb_dim
            self.use_static_emb = False
            self.use_dynamic_emb = True
        else:
            raise ValueError(f"Invalid combiner mode: {mode}")

    def __call__(self, static_emb, dynamic_emb):
        if self.mode == "static_only":
            # Zero-cost passthrough: no kernel, no copy.
            return static_emb
        if self.mode == "dynamic_only":
            return dynamic_emb

        # --- concat mode ---
        n = static_emb.shape[0]
        s_dim = self.static_emb_dim
        d_dim = self.dynamic_emb_dim
        out_dim = self.combined_emb_dim
        assert static_emb.shape == (n, s_dim)
        assert dynamic_emb.shape == (n, d_dim)

        # Mirror torch.cat dtype promotion, but do NOT widen if the dtypes
        # already match (keeps bf16 end-to-end -> half the HBM traffic).
        dtype = jnp.promote_types(static_emb.dtype, dynamic_emb.dtype)
        if static_emb.dtype != dtype:
            static_emb = static_emb.astype(dtype)
        if dynamic_emb.dtype != dtype:
            dynamic_emb = dynamic_emb.astype(dtype)

        tb = _pick_row_tile(n)
        grid = (pl.cdiv(n, tb),)
        itemsize = jnp.dtype(dtype).itemsize
        bytes_accessed = 2 * n * out_dim * itemsize  # read n*(S+D), write n*(S+D)

        return pl.pallas_call(
            _concat_kernel,
            out_shape=jax.ShapeDtypeStruct((n, out_dim), dtype),
            grid=grid,
            in_specs=[
                pl.BlockSpec((tb, s_dim), lambda i: (i, 0)),
                pl.BlockSpec((tb, d_dim), lambda i: (i, 0)),
            ],
            out_specs=pl.BlockSpec((tb, out_dim), lambda i: (i, 0)),
            compiler_params=pltpu.CompilerParams(
                dimension_semantics=("parallel",),
            ),
            cost_estimate=pl.CostEstimate(
                flops=0, transcendentals=0, bytes_accessed=bytes_accessed
            ),
        )(static_emb, dynamic_emb)

    def __repr__(self):
        return "%s(mode=%s, static_emb_dim=%d, dynamic_emb_dim=%d, combined_emb_dim=%d)" % (
            self.__class__.__name__,
            self.mode,
            self.static_emb_dim,
            self.dynamic_emb_dim,
            self.combined_emb_dim,
        )


if __name__ == "__main__":
    key = jax.random.PRNGKey(0)
    k_s, k_d = jax.random.split(key)

    batch = 8
    static_dim = 32
    dynamic_dim = 48

    static_emb = jax.random.normal(k_s, (batch, static_dim), dtype=jnp.float32)
    dynamic_emb = jax.random.normal(k_d, (batch, dynamic_dim), dtype=jnp.float32)

    ok = True

    # concat mode (small batch: single full-array block)
    combiner = StaticDynamicCombiner("concat", static_dim, dynamic_dim)
    out = jax.block_until_ready(combiner(static_emb, dynamic_emb))
    ref = jnp.concatenate([static_emb, dynamic_emb], axis=1)
    ok &= out.shape == (batch, static_dim + dynamic_dim)
    ok &= bool(jnp.allclose(out, ref))

    # concat mode with a larger, non-divisible batch to exercise the tiled
    # grid + boundary block path.
    big_n = 1000
    kb_s, kb_d = jax.random.split(jax.random.PRNGKey(1))
    big_s = jax.random.normal(kb_s, (big_n, static_dim), dtype=jnp.float32)
    big_d = jax.random.normal(kb_d, (big_n, dynamic_dim), dtype=jnp.float32)
    out_big = jax.block_until_ready(combiner(big_s, big_d))
    ref_big = jnp.concatenate([big_s, big_d], axis=1)
    ok &= bool(jnp.allclose(out_big, ref_big))

    # static_only mode (zero-copy passthrough)
    combiner_s = StaticDynamicCombiner("static_only", static_dim, dynamic_dim)
    out_s = jax.block_until_ready(combiner_s(static_emb, dynamic_emb))
    ok &= bool(jnp.allclose(out_s, static_emb))

    # dynamic_only mode (zero-copy passthrough)
    combiner_d = StaticDynamicCombiner("dynamic_only", static_dim, dynamic_dim)
    out_d = jax.block_until_ready(combiner_d(static_emb, dynamic_emb))
    ok &= bool(jnp.allclose(out_d, dynamic_emb))

    if ok:
        print("KERNEL_OK")
    else:
        raise SystemExit("mismatch vs reference")
</pallas_src>

<mosaic_0001>
module attributes {stable_mosaic.version = 11 : i64} {
  func.func @_concat_kernel(%arg0: i32, %arg1: memref<8x32xf32, #tpu.memory_space<vmem>>, %arg2: memref<8x48xf32, #tpu.memory_space<vmem>>, %arg3: memref<8x80xf32, #tpu.memory_space<vmem>>) attributes {dimension_semantics = [#tpu.dimension_semantics<parallel>], iteration_bounds = array<i64: 1>, scalar_prefetch = 0 : i64, scratch_operands = 0 : i64, tpu.core_type = #tpu.core_type<tc>, window_params = [{transform_indices = @transform_0, window_bounds = array<i64: 8, 32>}, {transform_indices = @transform_1, window_bounds = array<i64: 8, 48>}, {transform_indices = @transform_2, window_bounds = array<i64: 8, 80>}]} {
    %c0 = arith.constant 0 : index
    %c0_0 = arith.constant 0 : index
    %0 = vector.load %arg1[%c0, %c0_0] : memref<8x32xf32, #tpu.memory_space<vmem>>, vector<8x32xf32>
    %c0_1 = arith.constant 0 : index
    %c0_2 = arith.constant 0 : index
    %1 = vector.load %arg2[%c0_1, %c0_2] : memref<8x48xf32, #tpu.memory_space<vmem>>, vector<8x48xf32>
    %2 = tpu.concatenate %0, %1 in 1 : vector<8x32xf32>, vector<8x48xf32> -> vector<8x80xf32>
    %c0_3 = arith.constant 0 : index
    %c0_4 = arith.constant 0 : index
    %3 = vector.load %arg3[%c0_3, %c0_4] : memref<8x80xf32, #tpu.memory_space<vmem>>, vector<8x80xf32>
    tpu.vector_store %arg3[%c0_3, %c0_4], %2 {strides = array<i32>} : memref<8x80xf32, #tpu.memory_space<vmem>>, vector<8x80xf32>,
    return
  }
  func.func @transform_0(%arg0: i32) -> (i32, i32) {
    %c0_i32 = arith.constant 0 : i32
    %c0_i32_0 = arith.constant 0 : i32
    return %arg0, %c0_i32 : i32, i32
  }
  func.func @transform_1(%arg0: i32) -> (i32, i32) {
    %c0_i32 = arith.constant 0 : i32
    %c0_i32_0 = arith.constant 0 : i32
    return %arg0, %c0_i32 : i32, i32
  }
  func.func @transform_2(%arg0: i32) -> (i32, i32) {
    %c0_i32 = arith.constant 0 : i32
    %c0_i32_0 = arith.constant 0 : i32
    return %arg0, %c0_i32 : i32, i32
  }
}

</mosaic_0001>

<bundles_post_ra>
// kernel: tpu_custom_call.1
= control target key start
LH: loop header
LB: loop body
LE: loop exit
PB: predicated region body
PF: predicated region fallthrough
CT: control target
= control target key end

     0   :  { %7 = vsyncpa [#allocation3], 0  ;;  %s193_s0 = inlined_call_operand.hbm [shape: f32[8,32], index: 0, kind: input, shape index: {}]   ;;  %s194_s1 = inlined_call_operand.hbm [shape: f32[8,48], index: 1, kind: input, shape index: {}]   ;;  %s195_s2 = inlined_call_operand.hbm [shape: f32[8,80], index: 2, kind: output, shape index: {}]  }
   0x1   :  { %8 = vsyncpa [#allocation6], 0 }
   0x2   :  { %9 = vsyncpa [#allocation4], 0  ;;  %s138_s9 = smov [#allocation2]   ;;  %s139_s11 = smov [#allocation5]  }
   0x3   :  { %s16_s10 = sshll.u32 %s138_s9, 4  ;;  %s26_s12 = sshll.u32 %s139_s11, 4  ;;  %s17_s10 = int_to_ptr.vmem [resolvable:$true] %s16_s10  ;;  %s27_s12 = int_to_ptr.vmem [resolvable:$true] %s26_s12 }
   0x4   :  { %s66_s15 = scalar_lea.hbm %s193_s0, 128 }
   0x5   :  { %p67_p0 = scmp.ne.s32.totalorder %s193_s0, %s66_s15  ;;  %p70_p1 = scmp.lt.u32.totalorder %s66_s15, %s193_s0 }
   0x7   :  { %p72_p2 = pnand %p70_p1, %p67_p0 }
   0x9   :  { %75 = shalt.err (!%p72_p2)
}
   0xa   :  { %s76_s20 = scalar_lea.vmem %s17_s10, 128  ;;  %p81_p4 = scmp.lt.s32.totalorder %s17_s10, %s17_s10 }
   0xb   :  { %p77_p3 = scmp.ne.s32.totalorder %s17_s10, %s76_s20  ;;  %p82_p5 = scmp.lt.s32.totalorder %s76_s20, %s76_s20 }
   0xd   :  { %p83_p6 = por %p82_p5, %p81_p4 }
   0xf   :  { %p84_p7 = pnand %p83_p6, %p77_p3 }
  0x11   :  { %87 = shalt.err (!%p84_p7)
}
  0x12   :  { %19 = dma.hbm_to_vmem [thread:$0]  %s193_s0, 128, %s17_s10, [#allocation3]  }
  0x13   :  { %s88_s25 = scalar_lea.hbm %s194_s1, 128 }
  0x14   :  { %p89_p8 = scmp.ne.s32.totalorder %s194_s1, %s88_s25  ;;  %p92_p9 = scmp.lt.u32.totalorder %s88_s25, %s194_s1 }
  0x16   :  { %p94_p10 = pnand %p92_p9, %p89_p8 }
  0x18   :  { %97 = shalt.err (!%p94_p10)
}
  0x19   :  { %s98_s30 = scalar_lea.vmem %s27_s12, 128  ;;  %p103_p12 = scmp.lt.s32.totalorder %s27_s12, %s27_s12 }
  0x1a   :  { %p99_p11 = scmp.ne.s32.totalorder %s27_s12, %s98_s30  ;;  %p104_p13 = scmp.lt.s32.totalorder %s98_s30, %s98_s30 }
  0x1c   :  { %p105_p0 = por %p104_p13, %p103_p12 }
  0x1e   :  { %p106_p1 = pnand %p105_p0, %p99_p11 }
  0x20   :  { %109 = shalt.err (!%p106_p1)
}
  0x21   :  { %29 = dma.hbm_to_vmem [thread:$0]  %s194_s1, 128, %s27_s12, [#allocation6]  }
  0x22   :  { %132 = dma.done.wait [#allocation3], 128  }
  0x23   :  { %133 = vsyncadd [#allocation3], 4294967168 }
  0x24   :  { %134 = dma.done.wait [#allocation6], 128  }
  0x25   :  { %135 = vsyncadd [#allocation6], 4294967168  ;;  %v37_v0 = vld [vmem:[#allocation5] sm:$0xff]  ;;  %s140_s4 = smov 32   ;;  %s141_s5 = smov [#allocation7]   ;;  %v36_v1 = vld [vmem:[#allocation2] sm:$0xff] }
  0x26   :  { %39 = vrot.lane.b32.xlu0 %v37_v0, %s140_s4  ;;  %s52_s6 = sshll.u32 %s141_s5, 4  ;;  %vm42_vm0 = vcmask 261120   ;;  %vm44_vm1 = vcmask 654336   ;;  %s53_s6 = int_to_ptr.vmem [resolvable:$true] %s52_s6 }
  0x27   :  { %s110_s7 = scalar_lea.vmem %s53_s6, 128  ;;  %p115_p3 = scmp.lt.s32.totalorder %s53_s6, %s53_s6 }
  0x28   :  { %p111_p2 = scmp.ne.s32.totalorder %s53_s6, %s110_s7  ;;  %p116_p4 = scmp.lt.s32.totalorder %s110_s7, %s110_s7 }
  0x2a   :  { %p117_p5 = por %p116_p4, %p115_p3 }
  0x2c   :  { %p118_p6 = pnand %p117_p5, %p111_p2 }
  0x98   :  { %v40_v2 = vpop.permute.xlu0 %39 }
  0x99   :  { %v43_v3 = vsel %vm42_vm0, %v36_v1, %v40_v2 }
  0x9a   :  { %45 = vst.msk [vmem:[#allocation7] sm:$0xff] %vm44_vm1, %v43_v3 }
  0x9b   :  { %121 = shalt.err (!%p118_p6)
}
  0x9c   :  { %s122_s9 = scalar_lea.hbm %s195_s2, 128 }
  0x9d   :  { %p123_p7 = scmp.ne.s32.totalorder %s195_s2, %s122_s9  ;;  %p126_p8 = scmp.lt.u32.totalorder %s122_s9, %s195_s2 }
  0x9f   :  { %p128_p9 = pnand %p126_p8, %p123_p7 }
  0xa1   :  { %131 = shalt.err (!%p128_p9)
}
  0xa2   :  { %55 = dma.vmem_to_hbm [thread:$0]  %s53_s6, 128, %s195_s2, [#allocation4]  }
  0xa3   :  { %136 = dma.done.wait [#allocation4], 128  }
  0xa4   :  { %137 = vsyncadd [#allocation4], 4294967168 }
  0xa5   :  { %59 = vsyncpa [#allocation3], 1 }
  0xa6   :  { %60 = vsyncpa [#allocation6], 1 }
  0xa7   :  { %61 = vsyncpa [#allocation4], 1 }

</bundles_post_ra>
